<compile_context>
chip_gen: v7x
topology: tpu7x:2x2x1
jax: 0.10.0
libtpu: 0.0.40
codegen_flags: <defaults>
</compile_context>

<pallas_src>
import math

import jax
import jax.numpy as jnp
from jax.experimental import pallas as pl
from jax.experimental.pallas import tpu as pltpu


def _round_up(x: int, m: int) -> int:
    return ((x + m - 1) // m) * m


def _vmem_capacity_bytes() -> int:
    """Per-core VMEM capacity; conservative fallback (v7x = 64 MiB/TC)."""
    try:
        return int(pltpu.get_tpu_info().vmem_capacity_bytes)
    except Exception:
        return 64 * 1024 * 1024


def _vmem_footprint(batch_tile, k_tile, H_p, D_out_p, x_itemsize, out_itemsize):
    """Approximate double-buffered VMEM footprint of one grid step (bytes)."""
    x_buf = 2 * batch_tile * k_tile * x_itemsize          # x double buffer
    w1_buf = 2 * k_tile * H_p * 2                         # bf16 w1 K-slab, 2 bufs
    w2_buf = 2 * H_p * D_out_p * 2                        # bf16 w2 (resident)
    b_buf = 2 * (H_p + D_out_p) * 4                       # f32 biases
    out_buf = 2 * batch_tile * D_out_p * out_itemsize     # output double buffer
    acc = batch_tile * H_p * 4                            # f32 accumulator scratch
    return x_buf + w1_buf + w2_buf + b_buf + out_buf + acc


_K_CANDIDATES = (2048, 1024, 512, 256, 128)


def _select_tiles(B, D_in, H_p, D_out_p, x_itemsize, out_itemsize,
                  batch_tile, k_tile, vmem_budget):
    B_16 = _round_up(max(B, 1), 16)
    if batch_tile is None:
        if B_16 <= 16:
            batch_tile = B_16
        elif B_16 <= 512:
            # >= 2 blocks along the "parallel" batch axis so both v7x
            # TensorCores get work (costs one extra w1 stream on 1-TC chips).
            batch_tile = _round_up(-(-B_16 // 2), 16)
        else:
            batch_tile = 256
    batch_tile = max(16, _round_up(batch_tile, 16))

    D_in_128 = _round_up(D_in, 128)
    if k_tile is None:
        k_tile = 128
        for cand in _K_CANDIDATES:
            kt = min(cand, D_in_128)
            if _vmem_footprint(batch_tile, kt, H_p, D_out_p,
                               x_itemsize, out_itemsize) > vmem_budget:
                continue
            padded = _round_up(D_in_128, kt)
            # Accept at most ~25% zero-padding overhead along K.
            if padded - D_in_128 <= D_in_128 // 4:
                k_tile = kt
                break
    assert k_tile % 128 == 0, "k_tile must be a multiple of 128"

    # If the footprint still busts the budget (huge H on 64 MiB v7x VMEM),
    # shrink the batch tile rather than spilling.
    while (batch_tile > 16 and
           _vmem_footprint(batch_tile, k_tile, H_p, D_out_p,
                           x_itemsize, out_itemsize) > vmem_budget):
        batch_tile = max(16, _round_up(batch_tile // 2, 16))

    D_in_p = _round_up(D_in_128, k_tile)
    return batch_tile, k_tile, D_in_p


def _mlp_kernel(x_ref, w1_ref, b1_ref, w2_ref, b2_ref, o_ref, acc_ref):
    k = pl.program_id(1)

    # Fold b1 into the accumulator init (no per-step broadcast, no epilogue add).
    @pl.when(k == 0)
    def _init():
        acc_ref[...] = jnp.broadcast_to(b1_ref[...], acc_ref.shape)

    # Partial contraction over this K tile: bf16 inputs on the MXU, f32 acc.
    acc_ref[...] += jnp.dot(x_ref[...], w1_ref[...],
                            preferred_element_type=jnp.float32)

    @pl.when(k == pl.num_programs(1) - 1)
    def _epilogue():
        h = acc_ref[...]                       # f32, bias already included
        h = h * jax.nn.sigmoid(h)              # SiLU in f32 (VPU + EUP)
        out = jnp.dot(h.astype(w2_ref.dtype), w2_ref[...],
                      preferred_element_type=jnp.float32)
        out = out + b2_ref[...]
        o_ref[...] = out.astype(o_ref.dtype)


def distance_matrix_mlp(x, w1, b1, w2, b2, *, batch_tile=None, k_tile=None,
                        compute_dtype=jnp.bfloat16):
    """Fused MLP forward.

    x:(B, D_in), w1:(D_in, H), b1:(H,), w2:(H, D_out), b2:(D_out,).
    Returns (B, D_out) in x.dtype. MXU matmuls run in `compute_dtype`
    (default bf16) with f32 accumulation; bias adds and SiLU are f32.
    """
    B, D_in = x.shape
    H = w1.shape[1]
    D_out = w2.shape[1]
    assert w1.shape[0] == D_in and b1.shape == (H,)
    assert w2.shape[0] == H and b2.shape == (D_out,)

    out_dtype = x.dtype
    x_itemsize = jnp.dtype(compute_dtype).itemsize
    out_itemsize = jnp.dtype(out_dtype).itemsize

    # ---- Padded feature dims (multiples of 128 -> full-lane VPU/EUP/MXU) ----
    H_p = _round_up(H, 128)
    D_out_p = _round_up(D_out, 128)

    # ---- VMEM budget & tile selection ---------------------------------------
    vmem_cap = _vmem_capacity_bytes()
    vmem_budget = min(int(vmem_cap * 0.55), 72 * 1024 * 1024)
    batch_tile, k_tile, D_in_p = _select_tiles(
        B, D_in, H_p, D_out_p, x_itemsize, out_itemsize,
        batch_tile, k_tile, vmem_budget)
    B_p = _round_up(B, batch_tile)

    footprint = _vmem_footprint(batch_tile, k_tile, H_p, D_out_p,
                                x_itemsize, out_itemsize)
    vmem_limit = int(min(max(footprint + footprint // 2 + (2 << 20), 32 << 20),
                         int(vmem_cap * 0.75)))

    # ---- Pad operands (zero padding is an exact no-op for the matmuls) ------
    # x: cast to compute_dtype (halves the dominant HBM stream); pad only when
    # needed so XLA fuses a single read of f32 x / single write of bf16 xp.
    xq = x if x.dtype == compute_dtype else x.astype(compute_dtype)
    if (B_p, D_in_p) != (B, D_in):
        xp = jnp.pad(xq, ((0, B_p - B), (0, D_in_p - D_in)))
    else:
        xp = xq

    w1q = w1.astype(compute_dtype)
    if (D_in_p, H_p) != (D_in, H):
        w1p = jnp.pad(w1q, ((0, D_in_p - D_in), (0, H_p - H)))
    else:
        w1p = w1q

    w2q = w2.astype(compute_dtype)
    if (H_p, D_out_p) != (H, D_out):
        w2p = jnp.pad(w2q, ((0, H_p - H), (0, D_out_p - D_out)))
    else:
        w2p = w2q

    b1_2d = jnp.pad(b1.astype(jnp.float32), (0, H_p - H)).reshape(1, H_p)
    b2_2d = jnp.pad(b2.astype(jnp.float32), (0, D_out_p - D_out)).reshape(1, D_out_p)

    grid = (B_p // batch_tile, D_in_p // k_tile)
    num_batch_tiles = grid[0]

    flops = 2 * B_p * D_in_p * H_p + 2 * B_p * H_p * D_out_p
    # w1 is re-DMA'd once per batch tile (its K index wraps when i advances).
    bytes_accessed = (
        B_p * D_in_p * x_itemsize
        + num_batch_tiles * D_in_p * H_p * 2
        + H_p * D_out_p * 2
        + (H_p + D_out_p) * 4
        + B_p * D_out_p * out_itemsize)

    out = pl.pallas_call(
        _mlp_kernel,
        out_shape=jax.ShapeDtypeStruct((B_p, D_out_p), out_dtype),
        grid_spec=pltpu.PrefetchScalarGridSpec(
            num_scalar_prefetch=0,
            grid=grid,
            in_specs=[
                pl.BlockSpec((batch_tile, k_tile), lambda i, k: (i, k)),  # x tile (bf16)
                pl.BlockSpec((k_tile, H_p), lambda i, k: (k, 0)),         # w1 K-slab
                pl.BlockSpec((1, H_p), lambda i, k: (0, 0)),              # b1 (resident)
                pl.BlockSpec((H_p, D_out_p), lambda i, k: (0, 0)),        # w2 (resident)
                pl.BlockSpec((1, D_out_p), lambda i, k: (0, 0)),          # b2 (resident)
            ],
            out_specs=pl.BlockSpec((batch_tile, D_out_p), lambda i, k: (i, 0)),
            scratch_shapes=[pltpu.VMEM((batch_tile, H_p), jnp.float32)],
        ),
        compiler_params=pltpu.CompilerParams(
            dimension_semantics=("parallel", "arbitrary"),
            vmem_limit_bytes=vmem_limit,
        ),
        cost_estimate=pl.CostEstimate(
            flops=flops, transcendentals=B_p * H_p, bytes_accessed=bytes_accessed),
    )(xp, w1p, b1_2d, w2p, b2_2d)

    return out[:B, :D_out]


def init_params(key, num_taxa, hidden_dim, output_dim, dtype=jnp.float32):
    """Deterministic init mimicking PyTorch nn.Linear default (uniform +/- 1/sqrt(fan_in))."""
    num_distances = num_taxa * (num_taxa - 1) // 2
    input_dim = 8 * num_distances
    k1, k2, k3, k4 = jax.random.split(key, 4)

    bound1 = 1.0 / math.sqrt(input_dim)
    w1 = jax.random.uniform(k1, (input_dim, hidden_dim), dtype, -bound1, bound1)
    b1 = jax.random.uniform(k2, (hidden_dim,), dtype, -bound1, bound1)

    bound2 = 1.0 / math.sqrt(hidden_dim)
    w2 = jax.random.uniform(k3, (hidden_dim, output_dim), dtype, -bound2, bound2)
    b2 = jax.random.uniform(k4, (output_dim,), dtype, -bound2, bound2)
    return w1, b1, w2, b2


def reference_forward(x, w1, b1, w2, b2, compute_dtype=jnp.bfloat16):
    """Pure-JAX reference with the same bf16-input / f32-accumulate numerics."""
    h = jnp.dot(x.astype(compute_dtype), w1.astype(compute_dtype),
                preferred_element_type=jnp.float32) + b1.astype(jnp.float32)
    h = h * jax.nn.sigmoid(h)
    return jnp.dot(h.astype(compute_dtype), w2.astype(compute_dtype),
                   preferred_element_type=jnp.float32) + b2.astype(jnp.float32)


if __name__ == "__main__":
    key = jax.random.PRNGKey(0)

    # ---- Test 1: module-consistent small shapes (num_taxa=5 -> D_in=80) ----
    num_taxa, hidden_dim, output_dim, batch = 5, 32, 16, 8
    input_dim = 8 * (num_taxa * (num_taxa - 1) // 2)  # 80

    kx, kp, kx2, kp2 = jax.random.split(key, 4)
    x = jax.random.normal(kx, (batch, input_dim), jnp.float32)
    w1, b1, w2, b2 = init_params(kp, num_taxa, hidden_dim, output_dim)

    out = jax.block_until_ready(distance_matrix_mlp(x, w1, b1, w2, b2))
    ref = reference_forward(x, w1, b1, w2, b2)
    assert out.shape == (batch, output_dim)
    assert jnp.allclose(out, ref, atol=2e-3, rtol=2e-3), "mismatch vs reference (test 1)"

    # ---- Test 2: odd D_in (1088) + >=2 batch tiles with the default policy ---
    num_taxa2, hidden2, outdim2, batch2 = 17, 64, 24, 40
    input_dim2 = 8 * (num_taxa2 * (num_taxa2 - 1) // 2)  # 1088
    x2 = jax.random.normal(kx2, (batch2, input_dim2), jnp.float32)
    w12, b12, w22, b22 = init_params(kp2, num_taxa2, hidden2, outdim2)

    out2 = jax.block_until_ready(distance_matrix_mlp(x2, w12, b12, w22, b22))
    ref2 = reference_forward(x2, w12, b12, w22, b22)
    assert out2.shape == (batch2, outdim2)
    assert jnp.allclose(out2, ref2, atol=2e-3, rtol=2e-3), "mismatch vs reference (test 2)"

    # ---- Test 3: force multi-step K reduction + multiple batch tiles ---------
    out3 = jax.block_until_ready(
        distance_matrix_mlp(x2, w12, b12, w22, b22, batch_tile=16, k_tile=512))
    assert out3.shape == (batch2, outdim2)
    assert jnp.allclose(out3, ref2, atol=2e-3, rtol=2e-3), "mismatch vs reference (test 3)"

    print("KERNEL_OK")
</pallas_src>

<mosaic_0001>
module attributes {stable_mosaic.version = 11 : i64} {
  func.func @_mlp_kernel(%arg0: i32, %arg1: i32, %arg2: memref<16x128xbf16, #tpu.memory_space<vmem>>, %arg3: memref<128x128xbf16, #tpu.memory_space<vmem>>, %arg4: memref<1x128xf32, #tpu.memory_space<vmem>>, %arg5: memref<128x128xbf16, #tpu.memory_space<vmem>>, %arg6: memref<1x128xf32, #tpu.memory_space<vmem>>, %arg7: memref<16x128xf32, #tpu.memory_space<vmem>>, %arg8: memref<16x128xf32, #tpu.memory_space<vmem>>) attributes {dimension_semantics = [#tpu.dimension_semantics<parallel>, #tpu.dimension_semantics<arbitrary>], iteration_bounds = array<i64: 1, 1>, scalar_prefetch = 0 : i64, scratch_operands = 1 : i64, tpu.core_type = #tpu.core_type<tc>, window_params = [{transform_indices = @transform_0, window_bounds = array<i64: 16, 128>}, {transform_indices = @transform_1, window_bounds = array<i64: 128, 128>}, {pipeline_mode = #tpu.pipeline_mode<synchronous>, transform_indices = @transform_2, window_bounds = array<i64: 1, 128>}, {pipeline_mode = #tpu.pipeline_mode<synchronous>, transform_indices = @transform_3, window_bounds = array<i64: 128, 128>}, {pipeline_mode = #tpu.pipeline_mode<synchronous>, transform_indices = @transform_4, window_bounds = array<i64: 1, 128>}, {transform_indices = @transform_5, window_bounds = array<i64: 16, 128>}]} {
    %c0_i32 = arith.constant 0 : i32
    %0 = arith.cmpi eq, %arg1, %c0_i32 : i32
    %1 = arith.extui %0 : i1 to i32
    %c0_i32_0 = arith.constant 0 : i32
    %2 = arith.cmpi ne, %1, %c0_i32_0 : i32
    scf.if %2 {
      %c0_10 = arith.constant 0 : index
      %c0_11 = arith.constant 0 : index
      %12 = vector.load %arg4[%c0_10, %c0_11] : memref<1x128xf32, #tpu.memory_space<vmem>>, vector<1x128xf32>
      %13 = vector.shape_cast %12 : vector<1x128xf32> to vector<1x128xf32>
      %14 = vector.broadcast %13 : vector<1x128xf32> to vector<16x128xf32>
      %c0_12 = arith.constant 0 : index
      %c0_13 = arith.constant 0 : index
      %15 = vector.load %arg8[%c0_12, %c0_13] : memref<16x128xf32, #tpu.memory_space<vmem>>, vector<16x128xf32>
      tpu.vector_store %arg8[%c0_12, %c0_13], %14 {strides = array<i32>} : memref<16x128xf32, #tpu.memory_space<vmem>>, vector<16x128xf32>,
    } else {
    }
    %c0 = arith.constant 0 : index
    %c0_1 = arith.constant 0 : index
    %3 = vector.load %arg8[%c0, %c0_1] : memref<16x128xf32, #tpu.memory_space<vmem>>, vector<16x128xf32>
    %c0_2 = arith.constant 0 : index
    %c0_3 = arith.constant 0 : index
    %4 = vector.load %arg2[%c0_2, %c0_3] : memref<16x128xbf16, #tpu.memory_space<vmem>>, vector<16x128xbf16>
    %c0_4 = arith.constant 0 : index
    %c0_5 = arith.constant 0 : index
    %5 = vector.load %arg3[%c0_4, %c0_5] : memref<128x128xbf16, #tpu.memory_space<vmem>>, vector<128x128xbf16>
    %cst = arith.constant dense<0.000000e+00> : vector<16x128xf32>
    %6 = tpu.matmul %4, %5, %cst {dimension_numbers = #tpu.dot_dimension_numbers<[1], [0], [0], [1], [0, 0, 1, 1], [], []>} : vector<16x128xbf16>, vector<128x128xbf16>, vector<16x128xf32> -> vector<16x128xf32>
    %7 = arith.addf %3, %6 : vector<16x128xf32>
    %c0_6 = arith.constant 0 : index
    %c0_7 = arith.constant 0 : index
    %8 = vector.load %arg8[%c0_6, %c0_7] : memref<16x128xf32, #tpu.memory_space<vmem>>, vector<16x128xf32>
    tpu.vector_store %arg8[%c0_6, %c0_7], %7 {strides = array<i32>} : memref<16x128xf32, #tpu.memory_space<vmem>>, vector<16x128xf32>,
    %c0_i32_8 = arith.constant 0 : i32
    %9 = arith.cmpi eq, %arg1, %c0_i32_8 : i32
    %10 = arith.extui %9 : i1 to i32
    %c0_i32_9 = arith.constant 0 : i32
    %11 = arith.cmpi ne, %10, %c0_i32_9 : i32
    scf.if %11 {
      %c0_10 = arith.constant 0 : index
      %c0_11 = arith.constant 0 : index
      %12 = vector.load %arg8[%c0_10, %c0_11] : memref<16x128xf32, #tpu.memory_space<vmem>>, vector<16x128xf32>
      %13 = arith.negf %12 : vector<16x128xf32>
      %14 = math.exp %13 : vector<16x128xf32>
      %cst_12 = arith.constant 1.000000e+00 : f32
      %15 = vector.broadcast %cst_12 : f32 to vector<16x128xf32>
      %16 = arith.addf %15, %14 : vector<16x128xf32>
      %17 = arith.divf %15, %16 : vector<16x128xf32>
      %18 = arith.mulf %12, %17 : vector<16x128xf32>
      %19 = arith.truncf %18 : vector<16x128xf32> to vector<16x128xbf16>
      %c0_13 = arith.constant 0 : index
      %c0_14 = arith.constant 0 : index
      %20 = vector.load %arg5[%c0_13, %c0_14] : memref<128x128xbf16, #tpu.memory_space<vmem>>, vector<128x128xbf16>
      %cst_15 = arith.constant dense<0.000000e+00> : vector<16x128xf32>
      %21 = tpu.matmul %19, %20, %cst_15 {dimension_numbers = #tpu.dot_dimension_numbers<[1], [0], [0], [1], [0, 0, 1, 1], [], []>} : vector<16x128xbf16>, vector<128x128xbf16>, vector<16x128xf32> -> vector<16x128xf32>
      %c0_16 = arith.constant 0 : index
      %c0_17 = arith.constant 0 : index
      %22 = vector.load %arg6[%c0_16, %c0_17] : memref<1x128xf32, #tpu.memory_space<vmem>>, vector<1x128xf32>
      %23 = vector.broadcast %22 : vector<1x128xf32> to vector<16x128xf32>
      %24 = arith.addf %21, %23 : vector<16x128xf32>
      %c0_18 = arith.constant 0 : index
      %c0_19 = arith.constant 0 : index
      %25 = vector.load %arg7[%c0_18, %c0_19] : memref<16x128xf32, #tpu.memory_space<vmem>>, vector<16x128xf32>
      tpu.vector_store %arg7[%c0_18, %c0_19], %24 {strides = array<i32>} : memref<16x128xf32, #tpu.memory_space<vmem>>, vector<16x128xf32>,
    } else {
    }
    return
  }
  func.func @transform_0(%arg0: i32, %arg1: i32) -> (i32, i32) {
    %c0_i32 = arith.constant 0 : i32
    return %arg0, %arg1 : i32, i32
  }
  func.func @transform_1(%arg0: i32, %arg1: i32) -> (i32, i32) {
    %c0_i32 = arith.constant 0 : i32
    %c0_i32_0 = arith.constant 0 : i32
    return %arg1, %c0_i32 : i32, i32
  }
  func.func @transform_2(%arg0: i32, %arg1: i32) -> (i32, i32) {
    %c0_i32 = arith.constant 0 : i32
    %c0_i32_0 = arith.constant 0 : i32
    %c0_i32_1 = arith.constant 0 : i32
    return %c0_i32, %c0_i32_0 : i32, i32
  }
  func.func @transform_3(%arg0: i32, %arg1: i32) -> (i32, i32) {
    %c0_i32 = arith.constant 0 : i32
    %c0_i32_0 = arith.constant 0 : i32
    %c0_i32_1 = arith.constant 0 : i32
    return %c0_i32, %c0_i32_0 : i32, i32
  }
  func.func @transform_4(%arg0: i32, %arg1: i32) -> (i32, i32) {
    %c0_i32 = arith.constant 0 : i32
    %c0_i32_0 = arith.constant 0 : i32
    %c0_i32_1 = arith.constant 0 : i32
    return %c0_i32, %c0_i32_0 : i32, i32
  }
  func.func @transform_5(%arg0: i32, %arg1: i32) -> (i32, i32) {
    %c0_i32 = arith.constant 0 : i32
    %c0_i32_0 = arith.constant 0 : i32
    return %arg0, %c0_i32 : i32, i32
  }
}

</mosaic_0001>

<bundles_post_ra>
// kernel: tpu_custom_call.1
= control target key start
LH: loop header
LB: loop body
LE: loop exit
PB: predicated region body
PF: predicated region fallthrough
CT: control target
= control target key end

     0   :  { %10 = vsyncpa [#allocation4], 0  ;;  %s665_s0 = inlined_call_operand.hbm [shape: bf16[16,128], index: 0, kind: input, shape index: {}]   ;;  %s666_s1 = inlined_call_operand.hbm [shape: bf16[128,128], index: 1, kind: input, shape index: {}]   ;;  %s667_s2 = inlined_call_operand.vmem [shape: f32[1,128], index: 2, kind: input, shape index: {}]   ;;  %s668_s3 = inlined_call_operand.hbm [shape: bf16[128,128], index: 3, kind: input, shape index: {}]   ;;  %s669_s4 = inlined_call_operand.vmem [shape: f32[1,128], index: 4, kind: input, shape index: {}]   ;;  %s670_s5 = inlined_call_operand.hbm [shape: f32[16,128], index: 5, kind: output, shape index: {}]  }
   0x1   :  { %11 = vsyncpa [#allocation7], 0 }
   0x2   :  { %12 = vsyncpa [#allocation5], 0  ;;  %s555_s18 = smov [#allocation6]   ;;  %s556_s20 = smov [#allocation3]  }
   0x3   :  { %s30_s19 = sshll.u32 %s555_s18, 4  ;;  %s18_s21 = sshll.u32 %s556_s20, 4  ;;  %s31_s19 = int_to_ptr.vmem [resolvable:$true] %s30_s19  ;;  %s595_s21 = int_to_ptr.vmem [resolvable:$true] %s18_s21 }
   0x4   :  { %s461_s24 = scalar_lea.hbm %s666_s1, 1024 }
   0x5   :  { %p462_p0 = scmp.ne.s32.totalorder %s666_s1, %s461_s24  ;;  %p465_p1 = scmp.lt.u32.totalorder %s461_s24, %s666_s1 }
   0x7   :  { %p467_p2 = pnand %p465_p1, %p462_p0 }
   0x9   :  { %470 = shalt.err (!%p467_p2)
}
   0xa   :  { %s471_s29 = scalar_lea.vmem %s31_s19, 1024  ;;  %p476_p4 = scmp.lt.s32.totalorder %s31_s19, %s31_s19 }
   0xb   :  { %p472_p3 = scmp.ne.s32.totalorder %s31_s19, %s471_s29  ;;  %p477_p5 = scmp.lt.s32.totalorder %s471_s29, %s471_s29 }
   0xd   :  { %p478_p6 = por %p477_p5, %p476_p4 }
   0xf   :  { %p479_p7 = pnand %p478_p6, %p472_p3 }
  0x11   :  { %482 = shalt.err (!%p479_p7)
}
  0x12   :  { %s557_s30 = smov 64   ;;  %s558_s6 = smov 4  }
  0x13   :  { %36 = dma.hbm_to_vmem [thread:$0]  %s666_s1, 1024, %s31_s19, [#allocation7], %s557_s30, %s557_s30, %s558_s6  }
  0x14   :  { %s483_s11 = scalar_lea.hbm %s665_s0, 128 }
  0x15   :  { %p484_p8 = scmp.ne.s32.totalorder %s665_s0, %s483_s11  ;;  %p487_p9 = scmp.lt.u32.totalorder %s483_s11, %s665_s0 }
  0x17   :  { %p489_p10 = pnand %p487_p9, %p484_p8 }
  0x19   :  { %492 = shalt.err (!%p489_p10)
}
  0x1a   :  { %s493_s16 = scalar_lea.vmem %s595_s21, 128  ;;  %p498_p12 = scmp.lt.s32.totalorder %s595_s21, %s595_s21 }
  0x1b   :  { %p494_p11 = scmp.ne.s32.totalorder %s595_s21, %s493_s16  ;;  %p499_p13 = scmp.lt.s32.totalorder %s493_s16, %s493_s16 }
  0x1d   :  { %p500_p0 = por %p499_p13, %p498_p12 }
  0x1f   :  { %p501_p1 = pnand %p500_p0, %p494_p11 }
  0x21   :  { %504 = shalt.err (!%p501_p1)
}
  0x22   :  { %24 = dma.hbm_to_vmem [thread:$0]  %s665_s0, 128, %s595_s21, [#allocation4], %s557_s30, %s557_s30, %s558_s6  }
  0x23   :  { %s559_s18 = smov [#allocation8]   ;;  %s505_s23 = scalar_lea.hbm %s668_s3, 1024 }
  0x24   :  { %s44_s19 = sshll.u32 %s559_s18, 4  ;;  %p506_p2 = scmp.ne.s32.totalorder %s668_s3, %s505_s23  ;;  %s45_s19 = int_to_ptr.vmem [resolvable:$true] %s44_s19 }
  0x25   :  { %p509_p3 = scmp.lt.u32.totalorder %s505_s23, %s668_s3 }
  0x27   :  { %p511_p4 = pnand %p509_p3, %p506_p2 }
  0x29   :  { %514 = shalt.err (!%p511_p4)
}
  0x2a   :  { %s515_s28 = scalar_lea.vmem %s45_s19, 1024  ;;  %p520_p6 = scmp.lt.s32.totalorder %s45_s19, %s45_s19 }
  0x2b   :  { %p516_p5 = scmp.ne.s32.totalorder %s45_s19, %s515_s28  ;;  %p521_p7 = scmp.lt.s32.totalorder %s515_s28, %s515_s28 }
  0x2d   :  { %p522_p8 = por %p521_p7, %p520_p6 }
  0x2f   :  { %p523_p9 = pnand %p522_p8, %p516_p5 }
  0x31   :  { %526 = shalt.err (!%p523_p9)
}
  0x32   :  { %50 = dma.hbm_to_vmem [thread:$0]  %s668_s3, 1024, %s45_s19, [#allocation7], %s557_s30, %s557_s30, %s558_s6  }
  0x33   :  { %549 = dma.done.wait [#allocation4], 128  }
  0x34   :  { %550 = vsyncadd [#allocation4], 4294967168 }
  0x35   :  { %551 = dma.done.wait [#allocation7], 2048  }
  0x36   :  { %552 = vsyncadd [#allocation7], 4294965248  ;;  %v560_v0 = vmov 0.0   ;;  %vm561_vm0 = vmmov 0   ;;  %v436_v1 = vld [vmem:[#allocation6] sm:$0xff]   ;;  %v437_v2 = vld [vmem:[#allocation6 + $0x8] sm:$0xff]  }
  0x37   :  { %386 = vmatprep.subr.bf16.mxu0 %v560_v0  ;;  %402 = vmatprep.mubr.msk.bf16.mxu0 %vm561_vm0, %v560_v0  ;;  %v438_v3 = vld [vmem:[#allocation6 + $0x10] sm:$0xff]   ;;  %v439_v4 = vld [vmem:[#allocation6 + $0x18] sm:$0xff]   ;;  %v440_v5 = vld [vmem:[#allocation6 + $0x20] sm:$0xff]   ;;  %s562_s6 = smov [#allocation9]  }
  0x38   :  { %406 = vmatprep.subr.bf16.mxu1 %v560_v0  ;;  %422 = vmatprep.mubr.msk.bf16.mxu1 %vm561_vm0, %v560_v0  ;;  %v441_v6 = vld [vmem:[#allocation6 + $0x28] sm:$0xff]   ;;  %v442_v7 = vld [vmem:[#allocation6 + $0x30] sm:$0xff]   ;;  %v443_v8 = vld [vmem:[#allocation6 + $0x38] sm:$0xff]   ;;  %s334_s7 = sshll.u32 %s562_s6, 4  ;;  %s335_s7 = int_to_ptr.vmem [resolvable:$true] %s334_s7 }
  0x39   :  { %387 = vmatpush3.bf16.msra.mxu0 %v436_v1  ;;  %v444_v9 = vld [vmem:[#allocation3] sm:$0xff]   ;;  %v445_v10 = vld [vmem:[#allocation8] sm:$0xff]   ;;  %v446_v11 = vld [vmem:[#allocation8 + $0x8] sm:$0xff]   ;;  %s527_s8 = scalar_lea.vmem %s335_s7, 256  ;;  %p532_p11 = scmp.lt.s32.totalorder %s335_s7, %s335_s7 }
  0x3a   :  { %388 = vmatprep.subr.bf16.mxu0 %v560_v0  ;;  %407 = vmatpush3.bf16.msra.mxu1 %v445_v10  ;;  %v447_v12 = vld [vmem:[#allocation8 + $0x10] sm:$0xff]   ;;  %v448_v13 = vld [vmem:[#allocation8 + $0x18] sm:$0xff]   ;;  %v449_v14 = vld [vmem:[#allocation8 + $0x20] sm:$0xff]   ;;  %p528_p10 = scmp.ne.s32.totalorder %s335_s7, %s527_s8  ;;  %p533_p12 = scmp.lt.s32.totalorder %s527_s8, %s527_s8 }
  0x3b   :  { %408 = vmatprep.subr.bf16.mxu1 %v560_v0  ;;  %v450_v15 = vld [vmem:[#allocation8 + $0x28] sm:$0xff]   ;;  %v451_v16 = vld [vmem:[#allocation8 + $0x30] sm:$0xff]   ;;  %v452_v17 = vld [vmem:[#allocation8 + $0x38] sm:$0xff]  }
  0x3c   :  { %v347_v18 = vld [vmem:[%s667_s2] ss:$0 sm:$0xff]  ;;  %p534_p13 = por %p533_p12, %p532_p11 }
  0x3d   :  { %389 = vmatpush3.bf16.msra.mxu0 %v437_v2  ;;  %v359_v36 = vld [vmem:[%s669_s4] ss:$0 sm:$0xff] }
  0x3e   :  { %390 = vmatprep.subr.bf16.mxu0 %v560_v0  ;;  %409 = vmatpush3.bf16.msra.mxu1 %v446_v11  ;;  %p535_p0 = pnand %p534_p13, %p528_p10 }
  0x3f   :  { %410 = vmatprep.subr.bf16.mxu1 %v560_v0 }
  0x41   :  { %391 = vmatpush3.bf16.msra.mxu0 %v438_v3 }
  0x42   :  { %392 = vmatprep.subr.bf16.mxu0 %v560_v0  ;;  %411 = vmatpush3.bf16.msra.mxu1 %v447_v12 }
  0x43   :  { %412 = vmatprep.subr.bf16.mxu1 %v560_v0 }
  0x45   :  { %393 = vmatpush3.bf16.msra.mxu0 %v439_v4 }
  0x46   :  { %394 = vmatprep.subr.bf16.mxu0 %v560_v0  ;;  %413 = vmatpush3.bf16.msra.mxu1 %v448_v13 }
  0x47   :  { %414 = vmatprep.subr.bf16.mxu1 %v560_v0 }
  0x49   :  { %395 = vmatpush3.bf16.msra.mxu0 %v440_v5 }
  0x4a   :  { %396 = vmatprep.subr.bf16.mxu0 %v560_v0  ;;  %415 = vmatpush3.bf16.msra.mxu1 %v449_v14 }
  0x4b   :  { %416 = vmatprep.subr.bf16.mxu1 %v560_v0 }
  0x4d   :  { %397 = vmatpush3.bf16.msra.mxu0 %v441_v6 }
  0x4e   :  { %398 = vmatprep.subr.bf16.mxu0 %v560_v0  ;;  %417 = vmatpush3.bf16.msra.mxu1 %v450_v15 }
  0x4f   :  { %418 = vmatprep.subr.bf16.mxu1 %v560_v0 }
  0x51   :  { %399 = vmatpush3.bf16.msra.mxu0 %v442_v7 }
  0x52   :  { %400 = vmatprep.subr.bf16.mxu0 %v560_v0  ;;  %419 = vmatpush3.bf16.msra.mxu1 %v451_v16 }
  0x53   :  { %420 = vmatprep.subr.bf16.mxu1 %v560_v0 }
  0x55   :  { %401 = vmatpush3.bf16.msra.mxu0 %v443_v8 }
  0x56   :  { %421 = vmatpush3.bf16.msra.mxu1 %v452_v17 }
  0x58   :  { %403 = vmatmul.mubr.bf16.vlgmr.msra.gmra.mrb[0].mxu0 %v444_v9 }
 0x12b   :  { %v184_v19 = vpop.f32.mrb[0].mxu0 }
 0x12c   :  { %v191_v20 = vadd.f32 %v347_v18, %v184_v19  ;;  %v404_v21 = vpop.f32.mrb[1].mxu0 }
 0x12d   :  { %v187_v22 = vpop.f32.mrb[2].mxu0 }
 0x12e   :  { %v357_v23 = vmul.f32 -1.442695, %v191_v20  ;;  %v192_v24 = vadd.f32 %v347_v18, %v187_v22  ;;  %v405_v25 = vpop.f32.mrb[3].mxu0 }
 0x130   :  { %453 = vpow2.f32 %v357_v23  ;;  %v358_v26 = vmul.f32 -1.442695, %v192_v24 }
 0x132   :  { %455 = vpow2.f32 %v358_v26 }
 0x13a   :  { %v454_v27 = vpop.eup %453 }
 0x13b   :  { %v206_v28 = vadd.f32 1.0, %v454_v27 }
 0x13c   :  { %v456_v29 = vpop.eup %455 }
 0x13d   :  { %457 = vrcp.f32 %v206_v28  ;;  %v207_v30 = vadd.f32 1.0, %v456_v29 }
 0x13f   :  { %459 = vrcp.f32 %v207_v30 }
 0x147   :  { %v458_v31 = vpop.eup %457 }
 0x148   :  { %v212_v33 = vmul.f32 %v458_v31, %v191_v20 }
 0x149   :  { %v460_v32 = vpop.eup %459 }
 0x14a   :  { %v213_v34 = vmul.f32 %v460_v32, %v192_v24 }
 0x14c   :  { %v214_v35 = vpack.c.bf16 %v213_v34, %v212_v33 }
 0x14e   :  { %423 = vmatmul.mubr.bf16.vlgmr.msra.gmra.mrb[0].mxu1 %v214_v35 }
 0x221   :  { %v320_v37 = vpop.f32.mrb[0].mxu1 }
 0x222   :  { %v321_v38 = vadd.f32 %v359_v36, %v320_v37  ;;  %v424_v39 = vpop.f32.mrb[1].mxu1 }
 0x223   :  { %v323_v40 = vpop.f32.mrb[2].mxu1 }
 0x224   :  { %327 = vst [vmem:[#allocation9] sm:$0xff] %v321_v38  ;;  %v324_v41 = vadd.f32 %v359_v36, %v323_v40  ;;  %v425_v42 = vpop.f32.mrb[3].mxu1 }
 0x226   :  { %328 = vst [vmem:[#allocation9 + $0x8] sm:$0xff] %v324_v41 }
 0x227   :  { %538 = shalt.err (!%p535_p0)
}
 0x228   :  { %s539_s10 = scalar_lea.hbm %s670_s5, 256 }
 0x229   :  { %p540_p1 = scmp.ne.s32.totalorder %s670_s5, %s539_s10  ;;  %p543_p2 = scmp.lt.u32.totalorder %s539_s10, %s670_s5 }
 0x22b   :  { %p545_p3 = pnand %p543_p2, %p540_p1 }
 0x22d   :  { %548 = shalt.err (!%p545_p3)
}
 0x22e   :  { %s563_s15 = smov 128   ;;  %s564_s16 = smov 8  }
 0x22f   :  { %340 = dma.vmem_to_hbm [thread:$0]  %s335_s7, 256, %s670_s5, [#allocation5], %s563_s15, %s563_s15, %s564_s16  }
 0x230   :  { %553 = dma.done.wait [#allocation5], 256  }
 0x231   :  { %554 = vsyncadd [#allocation5], 4294967040 }
 0x232   :  { %344 = vsyncpa [#allocation4], 1 }
 0x233   :  { %345 = vsyncpa [#allocation7], 1 }
 0x234   :  { %346 = vsyncpa [#allocation5], 1 }

</bundles_post_ra>
